<compile_context>
chip_gen: v5e
topology: v5e:2x2
jax: 0.10.0
libtpu: 0.0.40
codegen_flags: <defaults>
</compile_context>

<pallas_src>
import functools

import jax
import jax.numpy as jnp
from jax.experimental import pallas as pl
from jax.experimental.pallas import tpu as pltpu


def _se_kernel(x_ref, w1t_ref, w2t_ref, o_ref, *, inv_hw):
    # x_ref:   (TB, C, HWp)  input tile (HWp is the zero-padded, lane-dense H*W)
    # w1t_ref: (C,  C_r)     fc_1.weight.T  (pre-transposed in the wrapper)
    # w2t_ref: (C_r, C)      fc_2.weight.T
    # o_ref:   (TB, C, HWp)
    x = x_ref[...]

    # Global average pool. Accumulate in f32; zero padding adds nothing and we
    # divide by the true H*W (inv_hw is a static Python float).
    pooled = jnp.sum(x.astype(jnp.float32), axis=2) * inv_hw          # (TB, C)

    # fc_1 + ReLU, fc_2 + ReLU (the reference module ReLUs after fc_2 too).
    y1 = jnp.maximum(
        jnp.dot(pooled, w1t_ref[...], preferred_element_type=jnp.float32), 0.0)
    y2 = jnp.maximum(
        jnp.dot(y1, w2t_ref[...], preferred_element_type=jnp.float32), 0.0)

    gate = jax.nn.sigmoid(y2).astype(o_ref.dtype)                     # (TB, C)

    # Channel-wise rescale in the input dtype; plain lane-dense store.
    o_ref[...] = x * gate[:, :, None]


def se_layer(x, w1, w2, *, max_tb=8):
    """x: (B, C, H, W); w1: (C//r, C) = fc_1.weight; w2: (C, C//r) = fc_2.weight."""
    b, c, h, w = x.shape
    hw = h * w
    dtype = x.dtype
    itemsize = jnp.dtype(dtype).itemsize
    c_r = w1.shape[0]

    # Lane-dense spatial axis: pad H*W up to a multiple of 128.
    hw_p = ((hw + 127) // 128) * 128

    # Batch tile: fill sublanes where possible, keep >=2 grid steps when B>=2
    # (so both v7x TensorCores get work and the pipeline has iterations), and
    # keep the double-buffered in+out footprint under a v7x-safe VMEM budget.
    tb = min(max_tb, b)
    if b >= 2:
        tb = min(tb, pl.cdiv(b, 2))
    vmem_budget = 48 << 20
    while tb > 1 and 4 * tb * c * hw_p * itemsize > vmem_budget:
        tb -= 1

    b_p = pl.cdiv(b, tb) * tb
    grid = (b_p // tb,)

    x_flat = x.reshape(b, c, hw)
    if hw_p != hw or b_p != b:
        x_flat = jnp.pad(x_flat, ((0, b_p - b), (0, 0), (0, hw_p - hw)))

    # Hoist the transpose + compute-dtype cast out of the kernel (done once).
    w1t = w1.T.astype(jnp.float32)   # (C, C_r)
    w2t = w2.T.astype(jnp.float32)   # (C_r, C)

    block_bytes = tb * c * hw_p * itemsize
    weight_bytes = (w1t.size + w2t.size) * 4
    vmem_limit = int(4 * block_bytes + 2 * weight_bytes + (4 << 20))
    vmem_limit = max(16 << 20, min(vmem_limit, 100 << 20))

    # Memory-bound op: tell the XLA scheduler what it actually costs.
    cost = pl.CostEstimate(
        flops=int(b_p * (2 * c * hw_p + 4 * c * c_r)),
        transcendentals=int(b_p * c),
        bytes_accessed=int(2 * b_p * c * hw_p * itemsize + weight_bytes),
    )

    kernel = functools.partial(_se_kernel, inv_hw=1.0 / hw)

    out = pl.pallas_call(
        kernel,
        out_shape=jax.ShapeDtypeStruct((b_p, c, hw_p), dtype),
        grid_spec=pltpu.PrefetchScalarGridSpec(
            num_scalar_prefetch=0,
            grid=grid,
            in_specs=[
                pl.BlockSpec((tb, c, hw_p), lambda i: (i, 0, 0)),
                pl.BlockSpec(w1t.shape, lambda i: (0, 0)),
                pl.BlockSpec(w2t.shape, lambda i: (0, 0)),
            ],
            out_specs=pl.BlockSpec((tb, c, hw_p), lambda i: (i, 0, 0)),
        ),
        compiler_params=pltpu.CompilerParams(
            dimension_semantics=("parallel",),
            vmem_limit_bytes=vmem_limit,
        ),
        cost_estimate=cost,
    )(x_flat, w1t, w2t)

    return out[:b, :, :hw].reshape(b, c, h, w)


def se_layer_ref(x, w1, w2):
    """Pure-JAX reference of the PyTorch forward."""
    y = jnp.mean(x, axis=(2, 3))                       # (B, C)
    y = jnp.maximum(y @ w1.T, 0.0)                     # fc_1 + ReLU
    y = jnp.maximum(y @ w2.T, 0.0)                     # fc_2 + ReLU
    y = jax.nn.sigmoid(y)                              # sigmoid
    return x * y[:, :, None, None]


if __name__ == "__main__":
    key = jax.random.PRNGKey(0)
    k_x, k_w1, k_w2 = jax.random.split(key, 3)

    B, C, H, W = 2, 32, 16, 16
    reduction = 16
    C_r = C // reduction                               # 2

    x = jax.random.normal(k_x, (B, C, H, W), dtype=jnp.float32)
    # Shapes match nn.Linear: (out_features, in_features), no bias.
    w1 = jax.random.normal(k_w1, (C_r, C), dtype=jnp.float32) * 0.1
    w2 = jax.random.normal(k_w2, (C, C_r), dtype=jnp.float32) * 0.1

    out = jax.block_until_ready(se_layer(x, w1, w2))
    ref = se_layer_ref(x, w1, w2)

    assert out.shape == (B, C, H, W)
    assert jnp.allclose(out, ref, atol=1e-5, rtol=1e-5), "mismatch vs reference"
    print("KERNEL_OK")
</pallas_src>

<mosaic_0001>
module attributes {stable_mosaic.version = 11 : i64} {
  func.func @_se_kernel(%arg0: i32, %arg1: memref<1x32x256xf32, #tpu.memory_space<vmem>>, %arg2: memref<32x2xf32, #tpu.memory_space<vmem>>, %arg3: memref<2x32xf32, #tpu.memory_space<vmem>>, %arg4: memref<1x32x256xf32, #tpu.memory_space<vmem>>) attributes {dimension_semantics = [#tpu.dimension_semantics<parallel>], iteration_bounds = array<i64: 2>, scalar_prefetch = 0 : i64, scratch_operands = 0 : i64, tpu.core_type = #tpu.core_type<tc>, window_params = [{transform_indices = @transform_0, window_bounds = array<i64: 1, 32, 256>}, {pipeline_mode = #tpu.pipeline_mode<synchronous>, transform_indices = @transform_1, window_bounds = array<i64: 32, 2>}, {pipeline_mode = #tpu.pipeline_mode<synchronous>, transform_indices = @transform_2, window_bounds = array<i64: 2, 32>}, {transform_indices = @transform_3, window_bounds = array<i64: 1, 32, 256>}]} {
    %c0 = arith.constant 0 : index
    %c0_0 = arith.constant 0 : index
    %c0_1 = arith.constant 0 : index
    %0 = vector.load %arg1[%c0, %c0_0, %c0_1] : memref<1x32x256xf32, #tpu.memory_space<vmem>>, vector<1x32x256xf32>
    %cst = arith.constant dense<0.000000e+00> : vector<1x32xf32>
    %1 = vector.multi_reduction <add>, %0, %cst [2] : vector<1x32x256xf32> to vector<1x32xf32>
    %cst_2 = arith.constant 3.906250e-03 : f32
    %2 = vector.broadcast %cst_2 : f32 to vector<1x32xf32>
    %3 = arith.mulf %1, %2 : vector<1x32xf32>
    %c0_3 = arith.constant 0 : index
    %c0_4 = arith.constant 0 : index
    %4 = vector.load %arg2[%c0_3, %c0_4] : memref<32x2xf32, #tpu.memory_space<vmem>>, vector<32x2xf32>
    %cst_5 = arith.constant dense<0.000000e+00> : vector<1x2xf32>
    %5 = tpu.matmul %3, %4, %cst_5 {dimension_numbers = #tpu.dot_dimension_numbers<[1], [0], [0], [1], [0, 0, 1, 1], [], []>} : vector<1x32xf32>, vector<32x2xf32>, vector<1x2xf32> -> vector<1x2xf32>
    %cst_6 = arith.constant 0.000000e+00 : f32
    %6 = vector.broadcast %cst_6 : f32 to vector<1x2xf32>
    %7 = arith.maximumf %5, %6 : vector<1x2xf32>
    %c0_7 = arith.constant 0 : index
    %c0_8 = arith.constant 0 : index
    %8 = vector.load %arg3[%c0_7, %c0_8] : memref<2x32xf32, #tpu.memory_space<vmem>>, vector<2x32xf32>
    %cst_9 = arith.constant dense<0.000000e+00> : vector<1x32xf32>
    %9 = tpu.matmul %7, %8, %cst_9 {dimension_numbers = #tpu.dot_dimension_numbers<[1], [0], [0], [1], [0, 0, 1, 1], [], []>} : vector<1x2xf32>, vector<2x32xf32>, vector<1x32xf32> -> vector<1x32xf32>
    %cst_10 = arith.constant 0.000000e+00 : f32
    %10 = vector.broadcast %cst_10 : f32 to vector<1x32xf32>
    %11 = arith.maximumf %9, %10 : vector<1x32xf32>
    %12 = arith.negf %11 : vector<1x32xf32>
    %13 = math.exp %12 : vector<1x32xf32>
    %cst_11 = arith.constant 1.000000e+00 : f32
    %14 = vector.broadcast %cst_11 : f32 to vector<1x32xf32>
    %15 = arith.addf %14, %13 : vector<1x32xf32>
    %16 = arith.divf %14, %15 : vector<1x32xf32>
    %17 = vector.shape_cast %16 : vector<1x32xf32> to vector<1x32x1xf32>
    %18 = vector.broadcast %17 : vector<1x32x1xf32> to vector<1x32x256xf32>
    %19 = arith.mulf %0, %18 : vector<1x32x256xf32>
    %c0_12 = arith.constant 0 : index
    %c0_13 = arith.constant 0 : index
    %c0_14 = arith.constant 0 : index
    %20 = vector.load %arg4[%c0_12, %c0_13, %c0_14] : memref<1x32x256xf32, #tpu.memory_space<vmem>>, vector<1x32x256xf32>
    tpu.vector_store %arg4[%c0_12, %c0_13, %c0_14], %19 {strides = array<i32>} : memref<1x32x256xf32, #tpu.memory_space<vmem>>, vector<1x32x256xf32>,
    return
  }
  func.func @transform_0(%arg0: i32) -> (i32, i32, i32) {
    %c0_i32 = arith.constant 0 : i32
    %c0_i32_0 = arith.constant 0 : i32
    %c0_i32_1 = arith.constant 0 : i32
    return %arg0, %c0_i32, %c0_i32_0 : i32, i32, i32
  }
  func.func @transform_1(%arg0: i32) -> (i32, i32) {
    %c0_i32 = arith.constant 0 : i32
    %c0_i32_0 = arith.constant 0 : i32
    %c0_i32_1 = arith.constant 0 : i32
    return %c0_i32, %c0_i32_0 : i32, i32
  }
  func.func @transform_2(%arg0: i32) -> (i32, i32) {
    %c0_i32 = arith.constant 0 : i32
    %c0_i32_0 = arith.constant 0 : i32
    %c0_i32_1 = arith.constant 0 : i32
    return %c0_i32, %c0_i32_0 : i32, i32
  }
  func.func @transform_3(%arg0: i32) -> (i32, i32, i32) {
    %c0_i32 = arith.constant 0 : i32
    %c0_i32_0 = arith.constant 0 : i32
    %c0_i32_1 = arith.constant 0 : i32
    return %arg0, %c0_i32, %c0_i32_0 : i32, i32, i32
  }
}

</mosaic_0001>

<bundles_post_ra>
// kernel: tpu_custom_call.1
= control target key start
LH: loop header
LB: loop body
LE: loop exit
PB: predicated region body
PF: predicated region fallthrough
CT: control target
= control target key end

     0   :  { %8 = vsyncpa [#allocation3], 0  ;;  %s820_s0 = inlined_call_operand.hbm [shape: f32[2,32,256], index: 0, kind: input, shape index: {}]   ;;  %s821_s1 = inlined_call_operand.vmem [shape: f32[32,2], index: 1, kind: input, shape index: {}]   ;;  %s822_s2 = inlined_call_operand.vmem [shape: f32[2,32], index: 2, kind: input, shape index: {}]   ;;  %s823_s3 = inlined_call_operand.hbm [shape: f32[2,32,256], index: 3, kind: output, shape index: {}]  }
   0x1   :  { %10 = vsyncpa [#allocation3 + $0x1], 0 }
   0x2   :  { %11 = vsyncpa [#allocation4], 0 }
   0x3   :  { %13 = vsyncpa [#allocation4 + $0x1], 0  ;;  %s642_s12 = smov 0   ;;  %s644_s13 = smov 0  }
   0x4   :  { %s646_s14 = smov 0   ;;  %s648_s15 = smov 0  }
   0x5 LB: > { %s663_s16 = sadd.s32 4294967295, %s616_s15   ;;  %s441_s17 = sadd.s32 4294967294, %s616_s15   ;;  %s616_s15 = sphi %s648_s15, %s833_s15   ;;  %s612_s14 = sphi %s646_s14, %s832_s14   ;;  %s608_s13 = sphi %s644_s13, %s831_s13   ;;  %s604_s12 = sphi %s642_s12, %s830_s12  }
   0x6   : > { %s667_s18 = sadd.s32 1, %s616_s15   ;;  %s26_s19 = sadd.s32 1, %s612_s14 }
   0x7   : > { %s23_s20 = ssub.s32 %s616_s15, %s667_s18  ;;  %p33_p0 = scmp.ne.s32.totalorder %s612_s14, %s608_s13 }
   0x8   : > { %p24_p1 = scmp.eq.s32.totalorder %s23_s20, 0  ;;  %p34_p2 = scmp.eq.s32.totalorder %s616_s15, 0 }
   0x9   : > { %p39_p3 = scmp.ne.s32.totalorder %s608_s13, %s604_s12  ;;  %p40_p4 = scmp.eq.s32.totalorder %s663_s16, 0 }
   0xa   : > { %s679_s21 = scalar_select %p24_p1, %s612_s14, %s26_s19  }
   0xb   : > { %p681_p5 = por %p34_p2, %p33_p0  ;;  %p685_p6 = por %p40_p4, %p39_p3 }
   0xc   : > { %p105_p7 = scmp.eq.s32.totalorder %s663_s16, 1  ;;  %p111_p8 = scmp.eq.s32.totalorder %s441_s17, 1 }
   0xd   : > { %p473_p10 = scmp.lt.s32.totalorder %s616_s15, 2  ;;  %s137_s26 = sand.u32 1, %s612_s14  }
   0xe   : > { %p692_p11 = por %p105_p7, %p33_p0  ;;  %p696_p12 = por %p111_p8, %p39_p3 }
   0xf   : > { %s459_s27 = sshll.u32 %s616_s15, 6  ;;  %s444_s28 = sshll.u32 %s137_s26, 6 }
  0x10   : > { %s146_s4 = scalar_lea.hbm %s820_s0, %s459_s27  ;;  %s141_s6 = scalar_lea.vmem [#allocation2], %s444_s28 }
  0x11   : > { %s147_s5 = sshll.u32 %s146_s4, 4  ;;  %s149_s7 = sshll.u32 %s141_s6, 4  ;;  %s148_s5 = int_to_ptr.hbm [resolvable:$true] %s147_s5  ;;  %s150_s7 = int_to_ptr.vmem [resolvable:$true] %s149_s7 }
  0x12   : > { %p707_p13 = pnand %p473_p10, %p681_p5  ;;  %p447_p0 = scmp.ge.s32.totalorder %s616_s15, 1 }
  0x13   : > { %p157_p1 = scmp.lt.s32.totalorder %s616_s15, 3  ;;  %s138_s9 = scalar_lea.sflag [#allocation3], %s137_s26 }
  0x14   : > { %s520_s10 = sshra.s32 %s148_s5, 4  ;;  %p524_p3 = pneg %p707_p13  ;;  %s521_s10 = int_to_ptr.hbm [resolvable:$true] %s520_s10 }
  0x15   : > { %s522_s11 = scalar_lea.hbm %s521_s10, 64  ;;  %s527_s20 = scalar_lea.hbm %s820_s0, 128 }
  0x16   : > { %p523_p2 = scmp.ne.s32.totalorder %s521_s10, %s522_s11  ;;  %p528_p5 = scmp.lt.s32.totalorder %s521_s10, %s820_s0 }
  0x17   : > { %p529_p8 = scmp.lt.s32.totalorder %s527_s20, %s522_s11 }
  0x18   : > { %p525_p4 = pnand %p524_p3, %p523_p2 }
  0x19   : > { %p530_p10 = por %p529_p8, %p528_p5 }
  0x1a   : > { %p526_p7 = pneg %p525_p4 }
  0x1c   : > { %p531_p9 = pnand %p530_p10, %p526_p7 }
  0x1e   : > { %534 = shalt.err (!%p531_p9)
}
  0x1f   : > { %s618_s26 = smov 256   ;;  %s619_s28 = smov 16  }
  0x20   : > { %468 = dma.hbm_to_vmem [thread:$0]  (!%p707_p13), %s148_s5, 1024, %s150_s7, %s138_s9, %s618_s26, %s618_s26, %s619_s28  }
  0x21   : > { %p158_p2 = pnand %p447_p0, %p157_p1 }
  0x22   : > { %s728_s29 = sand.u32 (!%p158_p2), 1, %s608_s13  }
  0x23   : > { %161 = sbr.rel (%p158_p2) target bundleno = 585 (0x249), region = 32  ;;  %s448_s30 = sshll.u32 (!%p158_p2), %s728_s29, 6 }
  0x24   : > { %s164_s4 = scalar_lea.sflag (!%p158_p2), [#allocation3], %s728_s29  ;;  %s167_s6 = scalar_lea.vmem (!%p158_p2), [#allocation2], %s448_s30 }
  0x28   : > { %595 = dma.done.wait (%p685_p6), %s164_s4, 1024  }
  0x29   : > { %597 = vsyncadd (%p685_p6), %s164_s4, 4294966272  ;;  %v738_v0 = vld [vmem:[%s167_s6] sm:$0xff]  ;;  %v740_v1 = vld [vmem:[%s167_s6 + $0x8] sm:$0xff]  ;;  %v223_v16 = vlaneseq  ;;  %vm228_vm0 = vcmask 130112   ;;  %vm232_vm1 = vcmask 195712   ;;  %vm236_vm2 = vcmask 261312  }
  0x2a   : > { %v742_v2 = vld [vmem:[%s167_s6 + $0x20] sm:$0xff]  ;;  %v199_v3 = vadd.f32 %v740_v1, %v738_v0  ;;  %v746_v4 = vld [vmem:[%s167_s6 + $0x28] sm:$0xff]  ;;  %v750_v6 = vld [vmem:[%s167_s6 + $0x10] sm:$0xff]  ;;  %vm238_vm3 = vcmask 261120   ;;  %vm267_vm4 = vcmask 1041408   ;;  %vm263_vm5 = vcmask 15360  }
  0x2b   : > { %v205_v5 = vadd.f32 %v746_v4, %v742_v2  ;;  %v752_v7 = vld [vmem:[%s167_s6 + $0x18] sm:$0xff]  ;;  %v754_v8 = vld [vmem:[%s167_s6 + $0x30] sm:$0xff]  ;;  %v216_v14 = vld [vmem:[%s821_s1 + $0x8] sm:$0xff]  ;;  %v224_v19 = vand.u32 127, %v223_v16  ;;  %v313_v39 = vshrl.u32 %v223_v16, 7  ;;  %s190_s22 = scalar_lea.vmem [#allocation5], %s448_s30 }
  0x2c   : > { %200 = vadd.xlane.f32.xlu0 %v199_v3  ;;  %v756_v9 = vld [vmem:[%s167_s6 + $0x38] sm:$0xff]  ;;  %v202_v10 = vadd.f32 %v752_v7, %v750_v6  ;;  %v217_v13 = vld [vmem:[%s821_s1 + $0x10] sm:$0xff]  ;;  %v215_v15 = vld [vmem:[%s821_s1] sm:$0xff]  ;;  %s460_s27 = sshll.u32 %s663_s16, 6  ;;  %s365_s6 = sshll.u32 %s190_s22, 4  ;;  %s366_s6 = int_to_ptr.vmem [resolvable:$true] %s365_s6 }
  0x2d   : > { %206 = vadd.xlane.f32.xlu1 %v205_v5  ;;  %v208_v11 = vadd.f32 %v756_v9, %v754_v8  ;;  %v218_v12 = vld [vmem:[%s821_s1 + $0x18] sm:$0xff]  ;;  %v226_v21 = vadd.s32 4294967288, %v224_v19  ;;  %v230_v22 = vadd.s32 4294967280, %v224_v19  ;;  %v234_v25 = vadd.s32 4294967272, %v224_v19  ;;  %v262_v36 = vld [vmem:[%s822_s2] sm:$0x3]  ;;  %511 = vset.pattern.permute.xlu2 %v313_v39  ;;  %s364_s4 = scalar_lea.hbm %s823_s3, %s460_s27 }
  0x2e   : > { %253 = vmatpush.msra.mxu0 %v218_v12  ;;  %451 = vmatpush.msk.msra.mxu1 %vm267_vm4, %v262_v36  ;;  %v332_v40 = vadd.s32 24, %v313_v39  ;;  %v326_v41 = vadd.s32 16, %v313_v39  ;;  %v320_v58 = vadd.s32 8, %v313_v39  ;;  %s367_s23 = sshll.u32 %s364_s4, 4  ;;  %s353_s16 = scalar_lea.sflag [#allocation4], %s728_s29  ;;  %s368_s23 = int_to_ptr.hbm [resolvable:$true] %s367_s23 }
  0x2f   : > { %s564_s30 = sshra.s32 %s368_s23, 4  ;;  %s570_s9 = scalar_lea.hbm %s823_s3, 128  ;;  %s565_s30 = int_to_ptr.hbm [resolvable:$true] %s564_s30 }
  0x30   : > { %254 = vmatpush.msra.mxu0 %v217_v13  ;;  %514 = vset.pattern.permute.xlu1 %v332_v40  ;;  %s566_s5 = scalar_lea.hbm %s565_s30, 64  ;;  %p571_p0 = scmp.lt.s32.totalorder %s565_s30, %s823_s3 }
  0x31   : > { %513 = vset.pattern.permute.xlu0 %v326_v41  ;;  %p567_p6 = scmp.ne.s32.totalorder %s565_s30, %s566_s5  ;;  %p572_p1 = scmp.lt.s32.totalorder %s570_s9, %s566_s5 }
  0x32   : > { %255 = vmatpush.msra.mxu0 %v216_v14 }
  0x33   : > { %p568_p9 = pnand %p567_p6, %p692_p11  ;;  %p573_p3 = por %p572_p1, %p571_p0 }
  0x34   : > { %203 = vadd.xlane.f32.xlu0 %v202_v10  ;;  %256 = vmatpush.msra.mxu0 %v215_v15 }
  0x35   : > { %209 = vadd.xlane.f32.xlu1 %v208_v11  ;;  %p569_p13 = pneg %p568_p9 }
  0x37   : > { %p574_p4 = pnand %p573_p3, %p569_p13 }
  0x9f   : > { %v201_v17 = vpop.xlane.xlu0 %200 }
  0xa0   : > { %v207_v18 = vpop.xlane.xlu1 %206  ;;  %v211_v20 = vmul.f32 0.00390625, %v201_v17 }
  0xa1   : > { %v213_v23 = vmul.f32 0.00390625, %v207_v18 }
  0xa2   : > { %v225_v29 = vperm.slane %v211_v20, %v224_v19 }
  0xa3   : > { %v231_v31 = vperm.slane %v213_v23, %v230_v22 }
  0xa7   : > { %v204_v24 = vpop.xlane.xlu0 %203 }
  0xa8   : > { %v212_v26 = vmul.f32 0.00390625, %v204_v24  ;;  %v210_v27 = vpop.xlane.xlu1 %209 }
  0xa9   : > { %v214_v28 = vmul.f32 0.00390625, %v210_v27 }
  0xaa   : > { %v227_v30 = vperm.slane %v212_v26, %v226_v21 }
  0xab   : > { %v235_v32 = vperm.slane %v214_v28, %v234_v25 }
  0xac   : > { %v229_v33 = vsel %vm228_vm0, %v227_v30, %v225_v29 }
  0xad   : > { %v233_v34 = vsel %vm232_vm1, %v231_v31, %v229_v33 }
  0xae   : > { %v237_v35 = vsel %vm236_vm2, %v235_v32, %v233_v34 }
  0xaf   : > { %450 = vmatmul.msk.f32.vlgmr.msra.gmra.mxu0 %vm238_vm3, %v237_v35 }
 0x12c   : > { %v258_v37 = vpop.f32.mrf.mxu0 }
 0x12d   : > { %v261_v38 = vmax.f32 %v258_v37, 0.0 }
 0x12f   : > { %452 = vmatmul.msk.f32.vlgmr.msra.gmra.mxu1 %vm263_vm5, %v261_v38 }
 0x1ac   : > { %v288_v42 = vpop.f32.mrf.mxu1 }
 0x1ad   : > { %v291_v43 = vmax.f32 %v288_v42, 0.0 }
 0x1af   : > { %v453_v44 = vmul.f32 -1.442695, %v291_v43 }
 0x1b1   : > { %516 = vpow2.f32 %v453_v44 }
 0x1b7   : > { %v517_v45 = vpop.eup %516 }
 0x1b8   : > { %v295_v46 = vadd.f32 1.0, %v517_v45 }
 0x1ba   : > { %518 = vrcp.f32 %v295_v46  ;;  %v307_v50 = vand.u32 2147483648, %v295_v46  ;;  %v305_v52 = vand.u32 2147483647, %v295_v46  ;;  %vm301_vm7 = vweird.f32 %v295_v46 }
 0x1bc   : > { %v308_v54 = vor.u32 1.1754944e-38, %v307_v50  ;;  %vm306_vm9 = vcmp.eq.f32.partialorder %v305_v52, 8.507059e+37 }
 0x1c0   : > { %v519_v47 = vpop.eup %518 }
 0x1c1   : > { %v297_v48 = vmul.f32 %v519_v47, %v295_v46  ;;  %vm302_vm6 = vweird.f32 %v519_v47 }
 0x1c2   : > { %vm303_vm8 = vmor %vm301_vm7, %vm302_vm6 }
 0x1c3   : > { %v298_v49 = vsub.f32 1.0, %v297_v48 }
 0x1c5   : > { %v299_v51 = vmul.f32 %v519_v47, %v298_v49 }
 0x1c7   : > { %v300_v53 = vadd.f32 %v519_v47, %v299_v51 }
 0x1c9   : > { %v304_v55 = vsel %vm303_vm8, %v519_v47, %v300_v53 }
 0x1ca   : > { %v309_v56 = vsel %vm306_vm9, %v308_v54, %v304_v55 }
 0x1cb   : > { %v311_v57 = vperm.slane %v309_v56, 0 }
 0x1cd   : > { %334 = vperm.xlu1 %514, %v311_v57   ;;  %328 = vperm.xlu0 %513, %v311_v57  }
 0x1ce   : > { %316 = vperm.xlu2 %511, %v311_v57  }
 0x1d5   : > { %515 = vset.pattern.permute.xlu0 %v332_v40 }
 0x1d6   : > { %512 = vset.pattern.permute.xlu2 %v320_v58 }
 0x1de   : > { %322 = vperm.xlu2 %512, %v311_v57  }
 0x228   : > { %v317_v59 = vpop.permute.xlu2 %316 }
 0x229   : > { %v336_v60 = vmul.f32 %v317_v59, %v738_v0  ;;  %v337_v61 = vmul.f32 %v317_v59, %v740_v1 }
 0x22b   : > { %344 = vst [vmem:[%s190_s22] sm:$0xff] %v336_v60 }
 0x22c   : > { %345 = vst [vmem:[%s190_s22 + $0x8] sm:$0xff] %v337_v61 }
 0x238   : > { %v323_v62 = vpop.permute.xlu2 %322 }
 0x239   : > { %v338_v63 = vmul.f32 %v323_v62, %v750_v6  ;;  %v339_v3 = vmul.f32 %v323_v62, %v752_v7 }
 0x23b   : > { %346 = vst [vmem:[%s190_s22 + $0x10] sm:$0xff] %v338_v63 }
 0x23c   : > { %347 = vst [vmem:[%s190_s22 + $0x18] sm:$0xff] %v339_v3 }
 0x23f   : > { %v335_v0 = vpop.permute.xlu1 %334  ;;  %v329_v1 = vpop.permute.xlu0 %328 }
 0x240   : > { %v342_v5 = vmul.f32 %v335_v0, %v754_v8  ;;  %v343_v10 = vmul.f32 %v335_v0, %v756_v9  ;;  %v340_v6 = vmul.f32 %v329_v1, %v742_v2  ;;  %v341_v7 = vmul.f32 %v329_v1, %v746_v4 }
 0x242   : > { %350 = vst [vmem:[%s190_s22 + $0x30] sm:$0xff] %v342_v5 }
 0x243   : > { %351 = vst [vmem:[%s190_s22 + $0x38] sm:$0xff] %v343_v10 }
 0x244   : > { %348 = vst [vmem:[%s190_s22 + $0x20] sm:$0xff] %v340_v6 }
 0x245   : > { %349 = vst [vmem:[%s190_s22 + $0x28] sm:$0xff] %v341_v7 }
 0x246   : > { %577 = shalt.err (!%p574_p4)
}
 0x247   : > { %s620_s29 = smov 256   ;;  %s621_s17 = smov 16  }
 0x248   : > { %463 = dma.vmem_to_hbm [thread:$0]  (%p692_p11), %s366_s6, 1024, %s368_s23, %s353_s16, %s620_s29, %s620_s29, %s621_s17  }
 0x249 PF: > { %s382_s19 = sand.u32 1, %s604_s12   ;;  %p829_p7 = scmp.ge.s32.totalorder %s616_s15, 2 }
 0x24a   : > { %s383_s20 = scalar_lea.sflag [#allocation4], %s382_s19 }
 0x24b   : > { %p470_p5 = pnand %p829_p7, %p696_p12 }
 0x24d   : > { %p471_p8 = pneg %p470_p5 }
 0x24f   : > { %599 = dma.done.wait (%p471_p8), %s383_s20, 1024  }
 0x250   : > { %601 = vsyncadd (%p471_p8), %s383_s20, 4294966272  ;;  %p16_p10 = scmp.ge.s32.totalorder %s667_s18, 4   ;;  %s830_s12 = smov %s608_s13 }
 0x251   : > { %s831_s13 = smov %s612_s14  ;;  %s832_s14 = smov %s679_s21 }
 0x252   : > { %s833_s15 = smov %s667_s18  ;;  %18 = sbr.rel (!%p16_p10) target bundleno = 5 (0x5), region = 77 }
 0x257   :  { %389 = vsyncpa [#allocation3], 1 }
 0x258   :  { %391 = vsyncpa [#allocation3 + $0x1], 1 }
 0x259   :  { %392 = vsyncpa [#allocation4], 1 }
 0x25a   :  { %394 = vsyncpa [#allocation4 + $0x1], 1 }

</bundles_post_ra>
